<compile_context>
chip_gen: v7x
topology: tpu7x:2x2x1
jax: 0.10.0
libtpu: 0.0.40
codegen_flags: <defaults>
</compile_context>

<pallas_src>
import math

import jax
import jax.numpy as jnp
from jax.experimental import pallas as pl
from jax.experimental.pallas import tpu as pltpu

# ----------------------------- model config ---------------------------------
INPUT_SIZE = 640
NUM_CLASSES = 640
HIDDEN = 128
BOTTLENECK = 8
# (in_channels, out_channels) of each of the ten 1x1-conv "fc" layers.
LAYER_DIMS = [
    (INPUT_SIZE, HIDDEN),
    (HIDDEN, HIDDEN),
    (HIDDEN, HIDDEN),
    (HIDDEN, HIDDEN),
    (HIDDEN, BOTTLENECK),
    (BOTTLENECK, HIDDEN),
    (HIDDEN, HIDDEN),
    (HIDDEN, HIDDEN),
    (HIDDEN, HIDDEN),
    (HIDDEN, NUM_CLASSES),
]
BN_EPS = 1e-5
MAX_TM = 256  # max batch-tile rows per grid step


def _round_up(a, b):
    return ((a + b - 1) // b) * b


# ------------------------------- kernel -------------------------------------
def _dense_ae_kernel(x_ref, w0_ref, wmid_ref, w9_ref, shift_ref, bias_ref, o_ref):
    """One batch tile of the full 10-layer MLP autoencoder.

    x_ref:     (TM, 640)      bf16  activations (batch tile)
    w0_ref:    (640, 128)     bf16  layer-0 weight, BN scale folded in
    wmid_ref:  (8, 128, 128)  bf16  layers 1..8 weights (BN folded, bottleneck
                                    pair zero-padded to 128 lanes)
    w9_ref:    (128, 640)     bf16  layer-9 weight (no BN)
    shift_ref: (9, 128)       f32   per-layer folded BN shift (beta - mean*scale)
    bias_ref:  (1, 640)       f32   layer-9 bias
    o_ref:     (TM, 640)      f32   output tile
    """
    # Layer 0: 640 -> 128 (MXU bf16 x bf16, f32 accumulation) + BN shift (f32).
    h = jnp.dot(x_ref[...], w0_ref[...], preferred_element_type=jnp.float32)
    h = h + shift_ref[0:1, :]

    # Layers 1..8: 128 -> 128 (bottleneck pair padded to 128, exact zeros).
    for li in range(8):
        h = jnp.dot(h.astype(jnp.bfloat16), wmid_ref[li],
                    preferred_element_type=jnp.float32)
        h = h + shift_ref[li + 1:li + 2, :]

    # Layer 9: 128 -> 640 with bias, no BN (module then takes [:, :, 0, 0]).
    h = jnp.dot(h.astype(jnp.bfloat16), w9_ref[...],
                preferred_element_type=jnp.float32)
    o_ref[...] = (h + bias_ref[...]).astype(o_ref.dtype)


# ------------------------------ wrapper --------------------------------------
@jax.jit
def tinyml_dense_ae_forward(x_nchw, w0, wmid, w9, shifts, bias):
    """x_nchw: (N, 640, 1, 1) -> (N, 640) f32."""
    n = x_nchw.shape[0]
    x = x_nchw[:, :, 0, 0].astype(jnp.bfloat16)          # (N, 640)

    tm = MAX_TM if n >= MAX_TM else _round_up(n, 8)      # batch tile (>=8 rows)
    total = _round_up(n, tm)
    x = jnp.pad(x, ((0, total - n), (0, 0)))             # (total, 640)
    grid = (total // tm,)

    param_elems = INPUT_SIZE * HIDDEN + 8 * HIDDEN * HIDDEN + HIDDEN * NUM_CLASSES
    flops = 2 * total * param_elems
    bytes_accessed = (
        2 * param_elems                      # bf16 weights
        + 4 * (9 * HIDDEN + NUM_CLASSES)     # f32 shifts + bias
        + 2 * total * INPUT_SIZE             # bf16 input
        + 4 * total * NUM_CLASSES            # f32 output
    )

    out = pl.pallas_call(
        _dense_ae_kernel,
        out_shape=jax.ShapeDtypeStruct((total, NUM_CLASSES), jnp.float32),
        grid=grid,
        in_specs=[
            pl.BlockSpec((tm, INPUT_SIZE), lambda i: (i, 0)),        # x (tiled)
            pl.BlockSpec((INPUT_SIZE, HIDDEN), lambda i: (0, 0)),    # w0 (resident)
            pl.BlockSpec((8, HIDDEN, HIDDEN), lambda i: (0, 0, 0)),  # wmid
            pl.BlockSpec((HIDDEN, NUM_CLASSES), lambda i: (0, 0)),   # w9
            pl.BlockSpec((9, HIDDEN), lambda i: (0, 0)),             # shifts
            pl.BlockSpec((1, NUM_CLASSES), lambda i: (0, 0)),        # bias
        ],
        out_specs=pl.BlockSpec((tm, NUM_CLASSES), lambda i: (i, 0)),
        compiler_params=pltpu.CompilerParams(
            dimension_semantics=("parallel",)),
        cost_estimate=pl.CostEstimate(
            flops=flops, transcendentals=0, bytes_accessed=bytes_accessed),
    )(x, w0, wmid, w9, shifts, bias)
    return out[:n]


# --------------------------- parameter handling -------------------------------
def init_params(key):
    """Deterministic init matching the PyTorch module's __init__ (raw params)."""
    keys = jax.random.split(key, len(LAYER_DIMS) + 1)
    weights = []   # (c_out, c_in) f32, like PyTorch conv weight (spatial squeezed)
    bn = []        # dicts of gamma/beta/running_mean/running_var
    for i, (c_in, c_out) in enumerate(LAYER_DIMS):
        # nn.Conv2d weight normal(0, sqrt(2 / (k*k*out))) with k=1.
        std = math.sqrt(2.0 / c_out)
        w = jax.random.normal(keys[i], (c_out, c_in), dtype=jnp.float32) * std
        weights.append(w)
        if i < 9:
            bn.append(dict(
                gamma=jnp.ones((c_out,), jnp.float32),
                beta=jnp.zeros((c_out,), jnp.float32),
                mean=jnp.zeros((c_out,), jnp.float32),
                var=jnp.ones((c_out,), jnp.float32),
            ))
    # fc_9 bias: Conv2d default uniform(-1/sqrt(fan_in), 1/sqrt(fan_in)).
    bound = 1.0 / math.sqrt(LAYER_DIMS[-1][0])
    bias9 = jax.random.uniform(keys[-1], (NUM_CLASSES,), jnp.float32,
                               minval=-bound, maxval=bound)
    return weights, bn, bias9


def prepare_params(weights, bn, bias9):
    """Fold eval-mode BN into weights, pad the bottleneck, pack, cast to bf16."""
    folded, shifts = [], []
    for i in range(9):
        scale = bn[i]["gamma"] / jnp.sqrt(bn[i]["var"] + BN_EPS)
        shift = bn[i]["beta"] - bn[i]["mean"] * scale
        folded.append(weights[i].T * scale[None, :])     # (c_in, c_out)
        shifts.append(shift)

    # Zero-pad the 128->8 / 8->128 bottleneck pair to 128 lanes (exact zeros,
    # so the result is identical; avoids sub-128-lane intermediates).
    w4 = jnp.pad(folded[4], ((0, 0), (0, HIDDEN - BOTTLENECK)))   # (128, 128)
    w5 = jnp.pad(folded[5], ((0, HIDDEN - BOTTLENECK), (0, 0)))   # (128, 128)
    shift4 = jnp.pad(shifts[4], (0, HIDDEN - BOTTLENECK))

    w0 = folded[0].astype(jnp.bfloat16)                           # (640, 128)
    wmid = jnp.stack(
        [folded[1], folded[2], folded[3], w4, w5,
         folded[6], folded[7], folded[8]], axis=0).astype(jnp.bfloat16)
    w9 = weights[9].T.astype(jnp.bfloat16)                        # (128, 640)
    shift_mat = jnp.stack(
        [shifts[0], shifts[1], shifts[2], shifts[3], shift4,
         shifts[5], shifts[6], shifts[7], shifts[8]], axis=0).astype(jnp.float32)
    bias = bias9.reshape(1, NUM_CLASSES).astype(jnp.float32)
    return w0, wmid, w9, shift_mat, bias


# ------------------------------ references -----------------------------------
def reference_matched(x_nchw, packed):
    """Pure-JAX reference with the SAME math/dtypes as the kernel."""
    w0, wmid, w9, shifts, bias = packed
    h = x_nchw[:, :, 0, 0].astype(jnp.bfloat16)
    h = jnp.dot(h, w0, preferred_element_type=jnp.float32) + shifts[0:1]
    for li in range(8):
        h = jnp.dot(h.astype(jnp.bfloat16), wmid[li],
                    preferred_element_type=jnp.float32) + shifts[li + 1:li + 2]
    return jnp.dot(h.astype(jnp.bfloat16), w9,
                   preferred_element_type=jnp.float32) + bias


def reference_fp32(x_nchw, weights, bn, bias9):
    """Full-precision reference matching the original PyTorch eval-mode math."""
    h = x_nchw[:, :, 0, 0].astype(jnp.float32)
    for i in range(9):
        scale = bn[i]["gamma"] / jnp.sqrt(bn[i]["var"] + BN_EPS)
        shift = bn[i]["beta"] - bn[i]["mean"] * scale
        h = h @ weights[i].T
        h = h * scale[None, :] + shift[None, :]
    return h @ weights[9].T + bias9[None, :]


# -------------------------------- main ---------------------------------------
if __name__ == "__main__":
    key = jax.random.PRNGKey(0)
    pkey, xkey = jax.random.split(key)

    weights, bn, bias9 = init_params(pkey)
    packed = prepare_params(weights, bn, bias9)

    batch = 2
    x = jax.random.normal(xkey, (batch, INPUT_SIZE, 1, 1), dtype=jnp.float32)

    out = tinyml_dense_ae_forward(x, *packed)
    out = jax.block_until_ready(out)
    assert out.shape == (batch, NUM_CLASSES), out.shape

    # Exact-math check (same bf16 weights/activations, f32 accumulation).
    ref_m = reference_matched(x, packed)
    assert jnp.allclose(out, ref_m, atol=1e-2, rtol=1e-2), "mismatch vs matched ref"

    # Loose check against the fp32 module semantics (bf16 weights => ~1% rel err).
    ref_f = reference_fp32(x, weights, bn, bias9)
    assert jnp.allclose(out, ref_f, atol=2.0, rtol=5e-2), "mismatch vs fp32 ref"

    print("KERNEL_OK")
</pallas_src>

<mosaic_0001>
module attributes {stable_mosaic.version = 11 : i64} {
  func.func @_dense_ae_kernel(%arg0: i32, %arg1: memref<8x640xbf16, #tpu.memory_space<vmem>>, %arg2: memref<640x128xbf16, #tpu.memory_space<vmem>>, %arg3: memref<8x128x128xbf16, #tpu.memory_space<vmem>>, %arg4: memref<128x640xbf16, #tpu.memory_space<vmem>>, %arg5: memref<9x128xf32, #tpu.memory_space<vmem>>, %arg6: memref<1x640xf32, #tpu.memory_space<vmem>>, %arg7: memref<8x640xf32, #tpu.memory_space<vmem>>) attributes {dimension_semantics = [#tpu.dimension_semantics<parallel>], iteration_bounds = array<i64: 1>, scalar_prefetch = 0 : i64, scratch_operands = 0 : i64, tpu.core_type = #tpu.core_type<tc>, window_params = [{transform_indices = @transform_0, window_bounds = array<i64: 8, 640>}, {pipeline_mode = #tpu.pipeline_mode<synchronous>, transform_indices = @transform_1, window_bounds = array<i64: 640, 128>}, {pipeline_mode = #tpu.pipeline_mode<synchronous>, transform_indices = @transform_2, window_bounds = array<i64: 8, 128, 128>}, {pipeline_mode = #tpu.pipeline_mode<synchronous>, transform_indices = @transform_3, window_bounds = array<i64: 128, 640>}, {pipeline_mode = #tpu.pipeline_mode<synchronous>, transform_indices = @transform_4, window_bounds = array<i64: 9, 128>}, {pipeline_mode = #tpu.pipeline_mode<synchronous>, transform_indices = @transform_5, window_bounds = array<i64: 1, 640>}, {transform_indices = @transform_6, window_bounds = array<i64: 8, 640>}]} {
    %c0 = arith.constant 0 : index
    %c0_0 = arith.constant 0 : index
    %0 = vector.load %arg1[%c0, %c0_0] : memref<8x640xbf16, #tpu.memory_space<vmem>>, vector<8x640xbf16>
    %c0_1 = arith.constant 0 : index
    %c0_2 = arith.constant 0 : index
    %1 = vector.load %arg2[%c0_1, %c0_2] : memref<640x128xbf16, #tpu.memory_space<vmem>>, vector<640x128xbf16>
    %cst = arith.constant dense<0.000000e+00> : vector<8x128xf32>
    %2 = tpu.matmul %0, %1, %cst {dimension_numbers = #tpu.dot_dimension_numbers<[1], [0], [0], [1], [0, 0, 1, 1], [], []>} : vector<8x640xbf16>, vector<640x128xbf16>, vector<8x128xf32> -> vector<8x128xf32>
    %c0_3 = arith.constant 0 : index
    %c0_4 = arith.constant 0 : index
    %3 = vector.load %arg5[%c0_3, %c0_4] : memref<9x128xf32, #tpu.memory_space<vmem>>, vector<1x128xf32>
    %4 = vector.broadcast %3 : vector<1x128xf32> to vector<8x128xf32>
    %5 = arith.addf %2, %4 : vector<8x128xf32>
    %6 = arith.truncf %5 : vector<8x128xf32> to vector<8x128xbf16>
    %c0_5 = arith.constant 0 : index
    %c0_6 = arith.constant 0 : index
    %c0_7 = arith.constant 0 : index
    %7 = vector.load %arg3[%c0_5, %c0_6, %c0_7] : memref<8x128x128xbf16, #tpu.memory_space<vmem>>, vector<1x128x128xbf16>
    %8 = vector.shape_cast %7 : vector<1x128x128xbf16> to vector<128x128xbf16>
    %cst_8 = arith.constant dense<0.000000e+00> : vector<8x128xf32>
    %9 = tpu.matmul %6, %8, %cst_8 {dimension_numbers = #tpu.dot_dimension_numbers<[1], [0], [0], [1], [0, 0, 1, 1], [], []>} : vector<8x128xbf16>, vector<128x128xbf16>, vector<8x128xf32> -> vector<8x128xf32>
    %c1 = arith.constant 1 : index
    %c0_9 = arith.constant 0 : index
    %10 = vector.load %arg5[%c1, %c0_9] : memref<9x128xf32, #tpu.memory_space<vmem>>, vector<1x128xf32>
    %11 = vector.broadcast %10 : vector<1x128xf32> to vector<8x128xf32>
    %12 = arith.addf %9, %11 : vector<8x128xf32>
    %13 = arith.truncf %12 : vector<8x128xf32> to vector<8x128xbf16>
    %c1_10 = arith.constant 1 : index
    %c0_11 = arith.constant 0 : index
    %c0_12 = arith.constant 0 : index
    %14 = vector.load %arg3[%c1_10, %c0_11, %c0_12] : memref<8x128x128xbf16, #tpu.memory_space<vmem>>, vector<1x128x128xbf16>
    %15 = vector.shape_cast %14 : vector<1x128x128xbf16> to vector<128x128xbf16>
    %cst_13 = arith.constant dense<0.000000e+00> : vector<8x128xf32>
    %16 = tpu.matmul %13, %15, %cst_13 {dimension_numbers = #tpu.dot_dimension_numbers<[1], [0], [0], [1], [0, 0, 1, 1], [], []>} : vector<8x128xbf16>, vector<128x128xbf16>, vector<8x128xf32> -> vector<8x128xf32>
    %c2 = arith.constant 2 : index
    %c0_14 = arith.constant 0 : index
    %17 = vector.load %arg5[%c2, %c0_14] : memref<9x128xf32, #tpu.memory_space<vmem>>, vector<1x128xf32>
    %18 = vector.broadcast %17 : vector<1x128xf32> to vector<8x128xf32>
    %19 = arith.addf %16, %18 : vector<8x128xf32>
    %20 = arith.truncf %19 : vector<8x128xf32> to vector<8x128xbf16>
    %c2_15 = arith.constant 2 : index
    %c0_16 = arith.constant 0 : index
    %c0_17 = arith.constant 0 : index
    %21 = vector.load %arg3[%c2_15, %c0_16, %c0_17] : memref<8x128x128xbf16, #tpu.memory_space<vmem>>, vector<1x128x128xbf16>
    %22 = vector.shape_cast %21 : vector<1x128x128xbf16> to vector<128x128xbf16>
    %cst_18 = arith.constant dense<0.000000e+00> : vector<8x128xf32>
    %23 = tpu.matmul %20, %22, %cst_18 {dimension_numbers = #tpu.dot_dimension_numbers<[1], [0], [0], [1], [0, 0, 1, 1], [], []>} : vector<8x128xbf16>, vector<128x128xbf16>, vector<8x128xf32> -> vector<8x128xf32>
    %c3 = arith.constant 3 : index
    %c0_19 = arith.constant 0 : index
    %24 = vector.load %arg5[%c3, %c0_19] : memref<9x128xf32, #tpu.memory_space<vmem>>, vector<1x128xf32>
    %25 = vector.broadcast %24 : vector<1x128xf32> to vector<8x128xf32>
    %26 = arith.addf %23, %25 : vector<8x128xf32>
    %27 = arith.truncf %26 : vector<8x128xf32> to vector<8x128xbf16>
    %c3_20 = arith.constant 3 : index
    %c0_21 = arith.constant 0 : index
    %c0_22 = arith.constant 0 : index
    %28 = vector.load %arg3[%c3_20, %c0_21, %c0_22] : memref<8x128x128xbf16, #tpu.memory_space<vmem>>, vector<1x128x128xbf16>
    %29 = vector.shape_cast %28 : vector<1x128x128xbf16> to vector<128x128xbf16>
    %cst_23 = arith.constant dense<0.000000e+00> : vector<8x128xf32>
    %30 = tpu.matmul %27, %29, %cst_23 {dimension_numbers = #tpu.dot_dimension_numbers<[1], [0], [0], [1], [0, 0, 1, 1], [], []>} : vector<8x128xbf16>, vector<128x128xbf16>, vector<8x128xf32> -> vector<8x128xf32>
    %c4 = arith.constant 4 : index
    %c0_24 = arith.constant 0 : index
    %31 = vector.load %arg5[%c4, %c0_24] : memref<9x128xf32, #tpu.memory_space<vmem>>, vector<1x128xf32>
    %32 = vector.broadcast %31 : vector<1x128xf32> to vector<8x128xf32>
    %33 = arith.addf %30, %32 : vector<8x128xf32>
    %34 = arith.truncf %33 : vector<8x128xf32> to vector<8x128xbf16>
    %c4_25 = arith.constant 4 : index
    %c0_26 = arith.constant 0 : index
    %c0_27 = arith.constant 0 : index
    %35 = vector.load %arg3[%c4_25, %c0_26, %c0_27] : memref<8x128x128xbf16, #tpu.memory_space<vmem>>, vector<1x128x128xbf16>
    %36 = vector.shape_cast %35 : vector<1x128x128xbf16> to vector<128x128xbf16>
    %cst_28 = arith.constant dense<0.000000e+00> : vector<8x128xf32>
    %37 = tpu.matmul %34, %36, %cst_28 {dimension_numbers = #tpu.dot_dimension_numbers<[1], [0], [0], [1], [0, 0, 1, 1], [], []>} : vector<8x128xbf16>, vector<128x128xbf16>, vector<8x128xf32> -> vector<8x128xf32>
    %c5 = arith.constant 5 : index
    %c0_29 = arith.constant 0 : index
    %38 = vector.load %arg5[%c5, %c0_29] : memref<9x128xf32, #tpu.memory_space<vmem>>, vector<1x128xf32>
    %39 = vector.broadcast %38 : vector<1x128xf32> to vector<8x128xf32>
    %40 = arith.addf %37, %39 : vector<8x128xf32>
    %41 = arith.truncf %40 : vector<8x128xf32> to vector<8x128xbf16>
    %c5_30 = arith.constant 5 : index
    %c0_31 = arith.constant 0 : index
    %c0_32 = arith.constant 0 : index
    %42 = vector.load %arg3[%c5_30, %c0_31, %c0_32] : memref<8x128x128xbf16, #tpu.memory_space<vmem>>, vector<1x128x128xbf16>
    %43 = vector.shape_cast %42 : vector<1x128x128xbf16> to vector<128x128xbf16>
    %cst_33 = arith.constant dense<0.000000e+00> : vector<8x128xf32>
    %44 = tpu.matmul %41, %43, %cst_33 {dimension_numbers = #tpu.dot_dimension_numbers<[1], [0], [0], [1], [0, 0, 1, 1], [], []>} : vector<8x128xbf16>, vector<128x128xbf16>, vector<8x128xf32> -> vector<8x128xf32>
    %c6 = arith.constant 6 : index
    %c0_34 = arith.constant 0 : index
    %45 = vector.load %arg5[%c6, %c0_34] : memref<9x128xf32, #tpu.memory_space<vmem>>, vector<1x128xf32>
    %46 = vector.broadcast %45 : vector<1x128xf32> to vector<8x128xf32>
    %47 = arith.addf %44, %46 : vector<8x128xf32>
    %48 = arith.truncf %47 : vector<8x128xf32> to vector<8x128xbf16>
    %c6_35 = arith.constant 6 : index
    %c0_36 = arith.constant 0 : index
    %c0_37 = arith.constant 0 : index
    %49 = vector.load %arg3[%c6_35, %c0_36, %c0_37] : memref<8x128x128xbf16, #tpu.memory_space<vmem>>, vector<1x128x128xbf16>
    %50 = vector.shape_cast %49 : vector<1x128x128xbf16> to vector<128x128xbf16>
    %cst_38 = arith.constant dense<0.000000e+00> : vector<8x128xf32>
    %51 = tpu.matmul %48, %50, %cst_38 {dimension_numbers = #tpu.dot_dimension_numbers<[1], [0], [0], [1], [0, 0, 1, 1], [], []>} : vector<8x128xbf16>, vector<128x128xbf16>, vector<8x128xf32> -> vector<8x128xf32>
    %c7 = arith.constant 7 : index
    %c0_39 = arith.constant 0 : index
    %52 = vector.load %arg5[%c7, %c0_39] : memref<9x128xf32, #tpu.memory_space<vmem>>, vector<1x128xf32>
    %53 = vector.broadcast %52 : vector<1x128xf32> to vector<8x128xf32>
    %54 = arith.addf %51, %53 : vector<8x128xf32>
    %55 = arith.truncf %54 : vector<8x128xf32> to vector<8x128xbf16>
    %c7_40 = arith.constant 7 : index
    %c0_41 = arith.constant 0 : index
    %c0_42 = arith.constant 0 : index
    %56 = vector.load %arg3[%c7_40, %c0_41, %c0_42] : memref<8x128x128xbf16, #tpu.memory_space<vmem>>, vector<1x128x128xbf16>
    %57 = vector.shape_cast %56 : vector<1x128x128xbf16> to vector<128x128xbf16>
    %cst_43 = arith.constant dense<0.000000e+00> : vector<8x128xf32>
    %58 = tpu.matmul %55, %57, %cst_43 {dimension_numbers = #tpu.dot_dimension_numbers<[1], [0], [0], [1], [0, 0, 1, 1], [], []>} : vector<8x128xbf16>, vector<128x128xbf16>, vector<8x128xf32> -> vector<8x128xf32>
    %c8 = arith.constant 8 : index
    %c0_44 = arith.constant 0 : index
    %59 = vector.load %arg5[%c8, %c0_44] : memref<9x128xf32, #tpu.memory_space<vmem>>, vector<1x128xf32>
    %60 = vector.broadcast %59 : vector<1x128xf32> to vector<8x128xf32>
    %61 = arith.addf %58, %60 : vector<8x128xf32>
    %62 = arith.truncf %61 : vector<8x128xf32> to vector<8x128xbf16>
    %c0_45 = arith.constant 0 : index
    %c0_46 = arith.constant 0 : index
    %63 = vector.load %arg4[%c0_45, %c0_46] : memref<128x640xbf16, #tpu.memory_space<vmem>>, vector<128x640xbf16>
    %cst_47 = arith.constant dense<0.000000e+00> : vector<8x640xf32>
    %64 = tpu.matmul %62, %63, %cst_47 {dimension_numbers = #tpu.dot_dimension_numbers<[1], [0], [0], [1], [0, 0, 1, 1], [], []>} : vector<8x128xbf16>, vector<128x640xbf16>, vector<8x640xf32> -> vector<8x640xf32>
    %c0_48 = arith.constant 0 : index
    %c0_49 = arith.constant 0 : index
    %65 = vector.load %arg6[%c0_48, %c0_49] : memref<1x640xf32, #tpu.memory_space<vmem>>, vector<1x640xf32>
    %66 = vector.broadcast %65 : vector<1x640xf32> to vector<8x640xf32>
    %67 = arith.addf %64, %66 : vector<8x640xf32>
    %c0_50 = arith.constant 0 : index
    %c0_51 = arith.constant 0 : index
    %68 = vector.load %arg7[%c0_50, %c0_51] : memref<8x640xf32, #tpu.memory_space<vmem>>, vector<8x640xf32>
    tpu.vector_store %arg7[%c0_50, %c0_51], %67 {strides = array<i32>} : memref<8x640xf32, #tpu.memory_space<vmem>>, vector<8x640xf32>,
    return
  }
  func.func @transform_0(%arg0: i32) -> (i32, i32) {
    %c0_i32 = arith.constant 0 : i32
    %c0_i32_0 = arith.constant 0 : i32
    return %arg0, %c0_i32 : i32, i32
  }
  func.func @transform_1(%arg0: i32) -> (i32, i32) {
    %c0_i32 = arith.constant 0 : i32
    %c0_i32_0 = arith.constant 0 : i32
    %c0_i32_1 = arith.constant 0 : i32
    return %c0_i32, %c0_i32_0 : i32, i32
  }
  func.func @transform_2(%arg0: i32) -> (i32, i32, i32) {
    %c0_i32 = arith.constant 0 : i32
    %c0_i32_0 = arith.constant 0 : i32
    %c0_i32_1 = arith.constant 0 : i32
    %c0_i32_2 = arith.constant 0 : i32
    return %c0_i32, %c0_i32_0, %c0_i32_1 : i32, i32, i32
  }
  func.func @transform_3(%arg0: i32) -> (i32, i32) {
    %c0_i32 = arith.constant 0 : i32
    %c0_i32_0 = arith.constant 0 : i32
    %c0_i32_1 = arith.constant 0 : i32
    return %c0_i32, %c0_i32_0 : i32, i32
  }
  func.func @transform_4(%arg0: i32) -> (i32, i32) {
    %c0_i32 = arith.constant 0 : i32
    %c0_i32_0 = arith.constant 0 : i32
    %c0_i32_1 = arith.constant 0 : i32
    return %c0_i32, %c0_i32_0 : i32, i32
  }
  func.func @transform_5(%arg0: i32) -> (i32, i32) {
    %c0_i32 = arith.constant 0 : i32
    %c0_i32_0 = arith.constant 0 : i32
    %c0_i32_1 = arith.constant 0 : i32
    return %c0_i32, %c0_i32_0 : i32, i32
  }
  func.func @transform_6(%arg0: i32) -> (i32, i32) {
    %c0_i32 = arith.constant 0 : i32
    %c0_i32_0 = arith.constant 0 : i32
    return %arg0, %c0_i32 : i32, i32
  }
}

</mosaic_0001>

<bundles_post_ra>
// kernel: tinyml_dense_ae_forward.1
= control target key start
LH: loop header
LB: loop body
LE: loop exit
PB: predicated region body
PF: predicated region fallthrough
CT: control target
= control target key end

     0   :  { %11 = vsyncpa [#allocation3], 0  ;;  %s2814_s0 = inlined_call_operand.vmem [shape: bf16[8,640], index: 0, kind: input, shape index: {}]   ;;  %s2815_s1 = inlined_call_operand.hbm [shape: bf16[640,128], index: 1, kind: input, shape index: {}]   ;;  %s2816_s2 = inlined_call_operand.hbm [shape: bf16[8,128,128], index: 2, kind: input, shape index: {}]   ;;  %s2817_s3 = inlined_call_operand.hbm [shape: bf16[128,640], index: 3, kind: input, shape index: {}]   ;;  %s2818_s4 = inlined_call_operand.vmem [shape: f32[9,128], index: 4, kind: input, shape index: {}]   ;;  %s2819_s5 = inlined_call_operand.vmem [shape: f32[1,640], index: 5, kind: input, shape index: {}]   ;;  %s2820_s6 = inlined_call_operand.vmem [shape: f32[8,640], index: 6, kind: output, shape index: {}]  }
   0x1   :  { %12 = vsyncpa [#allocation5], 0  ;;  %s2572_s21 = smov [#allocation4]   ;;  %s2573_s23 = smov [#allocation2]  }
   0x2   :  { %s32_s22 = sshll.u32 %s2572_s21, 4  ;;  %s20_s24 = sshll.u32 %s2573_s23, 4  ;;  %s33_s22 = int_to_ptr.vmem [resolvable:$true] %s32_s22  ;;  %s2617_s24 = int_to_ptr.vmem [resolvable:$true] %s20_s24 }
   0x3   :  { %s2502_s27 = scalar_lea.hbm %s2816_s2, 8192 }
   0x4   :  { %p2503_p0 = scmp.ne.s32.totalorder %s2816_s2, %s2502_s27  ;;  %p2506_p1 = scmp.lt.u32.totalorder %s2502_s27, %s2816_s2 }
   0x6   :  { %p2508_p2 = pnand %p2506_p1, %p2503_p0 }
   0x8   :  { %2511 = shalt.err (!%p2508_p2)
}
   0x9   :  { %s2512_s8 = scalar_lea.vmem %s33_s22, 8192  ;;  %p2517_p4 = scmp.lt.s32.totalorder %s33_s22, %s33_s22 }
   0xa   :  { %p2513_p3 = scmp.ne.s32.totalorder %s33_s22, %s2512_s8  ;;  %p2518_p5 = scmp.lt.s32.totalorder %s2512_s8, %s2512_s8 }
   0xc   :  { %p2519_p6 = por %p2518_p5, %p2517_p4 }
   0xe   :  { %p2520_p7 = pnand %p2519_p6, %p2513_p3 }
  0x10   :  { %2523 = shalt.err (!%p2520_p7)
}
  0x11   :  { %s2574_s9 = smov 64   ;;  %s2575_s10 = smov 4  }
  0x12   :  { %38 = dma.hbm_to_vmem [thread:$0]  %s2816_s2, 8192, %s33_s22, [#allocation5], %s2574_s9, %s2574_s9, %s2575_s10  }
  0x13   :  { %s2524_s15 = scalar_lea.hbm %s2815_s1, 5120 }
  0x14   :  { %p2525_p8 = scmp.ne.s32.totalorder %s2815_s1, %s2524_s15  ;;  %p2528_p9 = scmp.lt.u32.totalorder %s2524_s15, %s2815_s1 }
  0x16   :  { %p2530_p10 = pnand %p2528_p9, %p2525_p8 }
  0x18   :  { %2533 = shalt.err (!%p2530_p10)
}
  0x19   :  { %s2534_s20 = scalar_lea.vmem %s2617_s24, 5120  ;;  %p2539_p12 = scmp.lt.s32.totalorder %s2617_s24, %s2617_s24 }
  0x1a   :  { %p2535_p11 = scmp.ne.s32.totalorder %s2617_s24, %s2534_s20  ;;  %p2540_p13 = scmp.lt.s32.totalorder %s2534_s20, %s2534_s20 }
  0x1c   :  { %p2541_p0 = por %p2540_p13, %p2539_p12 }
  0x1e   :  { %p2542_p1 = pnand %p2541_p0, %p2535_p11 }
  0x20   :  { %2545 = shalt.err (!%p2542_p1)
}
  0x21   :  { %26 = dma.hbm_to_vmem [thread:$0]  %s2815_s1, 5120, %s2617_s24, [#allocation3], %s2574_s9, %s2574_s9, %s2575_s10  }
  0x22   :  { %s2576_s22 = smov [#allocation6]   ;;  %s2546_s27 = scalar_lea.hbm %s2817_s3, 5120 }
  0x23   :  { %s44_s23 = sshll.u32 %s2576_s22, 4  ;;  %p2547_p2 = scmp.ne.s32.totalorder %s2817_s3, %s2546_s27  ;;  %s45_s23 = int_to_ptr.vmem [resolvable:$true] %s44_s23 }
  0x24   :  { %p2550_p3 = scmp.lt.u32.totalorder %s2546_s27, %s2817_s3 }
  0x26   :  { %p2552_p4 = pnand %p2550_p3, %p2547_p2 }
  0x28   :  { %2555 = shalt.err (!%p2552_p4)
}
  0x29   :  { %s2556_s8 = scalar_lea.vmem %s45_s23, 5120  ;;  %p2561_p6 = scmp.lt.s32.totalorder %s45_s23, %s45_s23 }
  0x2a   :  { %p2557_p5 = scmp.ne.s32.totalorder %s45_s23, %s2556_s8  ;;  %p2562_p7 = scmp.lt.s32.totalorder %s2556_s8, %s2556_s8 }
  0x2c   :  { %p2563_p8 = por %p2562_p7, %p2561_p6 }
  0x2e   :  { %p2564_p9 = pnand %p2563_p8, %p2557_p5 }
  0x30   :  { %2567 = shalt.err (!%p2564_p9)
}
  0x31   :  { %s2577_s1 = smov 320   ;;  %s2578_s24 = smov 20  }
  0x32   :  { %50 = dma.hbm_to_vmem [thread:$0]  %s2817_s3, 5120, %s45_s23, [#allocation5], %s2577_s1, %s2577_s1, %s2578_s24  }
  0x33   :  { %2568 = dma.done.wait [#allocation3], 5120  }
  0x34   :  { %2569 = vsyncadd [#allocation3], 4294962176 }
  0x35   :  { %2570 = dma.done.wait [#allocation5], 13312  }
  0x36   :  { %2571 = vsyncadd [#allocation5], 4294953984  ;;  %v2337_v0 = vld [vmem:[#allocation2 + $0x40] sm:$0xff]   ;;  %v2341_v4 = vld [vmem:[#allocation2 + $0x48] sm:$0xff]   ;;  %v2579_v35 = vmov 0.0   ;;  %vm2580_vm0 = vmmov 0  }
  0x37   :  { %v2338_v1 = vld [vmem:[#allocation2] sm:$0xff]   ;;  %1993 = vmatprep.subr.bf16.mxu0 %v2337_v0  ;;  %v2342_v5 = vld [vmem:[#allocation2 + $0x8] sm:$0xff]   ;;  %v2345_v8 = vld [vmem:[#allocation2 + $0x50] sm:$0xff]  }
  0x38   :  { %v2339_v2 = vld [vmem:[#allocation2 + $0xc0] sm:$0xff]   ;;  %1994 = vmatpush3.bf16.msra.mxu0 %v2338_v1  ;;  %v2343_v6 = vld [vmem:[#allocation2 + $0xc8] sm:$0xff]   ;;  %v2346_v9 = vld [vmem:[#allocation2 + $0x10] sm:$0xff]  }
  0x39   :  { %v2340_v3 = vld [vmem:[#allocation2 + $0x80] sm:$0xff]   ;;  %2015 = vmatprep.subr.bf16.mxu1 %v2339_v2  ;;  %1995 = vmatprep.subr.bf16.mxu0 %v2341_v4  ;;  %v2344_v7 = vld [vmem:[#allocation2 + $0x88] sm:$0xff]   ;;  %v2347_v10 = vld [vmem:[#allocation2 + $0xd0] sm:$0xff]  }
  0x3a   :  { %2016 = vmatpush3.bf16.msra.mxu1 %v2340_v3  ;;  %v2348_v11 = vld [vmem:[#allocation2 + $0x90] sm:$0xff]   ;;  %v2349_v12 = vld [vmem:[#allocation2 + $0x58] sm:$0xff]   ;;  %v2353_v16 = vld [vmem:[#allocation2 + $0x60] sm:$0xff]  }
  0x3b   :  { %2017 = vmatprep.subr.bf16.mxu1 %v2343_v6  ;;  %v2350_v13 = vld [vmem:[#allocation2 + $0x18] sm:$0xff]   ;;  %v2354_v17 = vld [vmem:[#allocation2 + $0x20] sm:$0xff]   ;;  %v2357_v20 = vld [vmem:[#allocation2 + $0x68] sm:$0xff]  }
  0x3c   :  { %1996 = vmatpush3.bf16.msra.mxu0 %v2342_v5  ;;  %v2351_v14 = vld [vmem:[#allocation2 + $0xd8] sm:$0xff]   ;;  %v2355_v18 = vld [vmem:[#allocation2 + $0xe0] sm:$0xff]   ;;  %v2358_v21 = vld [vmem:[#allocation2 + $0x28] sm:$0xff]  }
  0x3d   :  { %1997 = vmatprep.subr.bf16.mxu0 %v2345_v8  ;;  %v2352_v15 = vld [vmem:[#allocation2 + $0x98] sm:$0xff]   ;;  %v2356_v19 = vld [vmem:[#allocation2 + $0xa0] sm:$0xff]   ;;  %v2359_v22 = vld [vmem:[#allocation2 + $0xe8] sm:$0xff]  }
  0x3e   :  { %2018 = vmatpush3.bf16.msra.mxu1 %v2344_v7  ;;  %v2360_v23 = vld [vmem:[#allocation2 + $0xa8] sm:$0xff]   ;;  %v2361_v24 = vld [vmem:[#allocation2 + $0x70] sm:$0xff]   ;;  %v2365_v28 = vld [vmem:[#allocation2 + $0x78] sm:$0xff]  }
  0x3f   :  { %2019 = vmatprep.subr.bf16.mxu1 %v2347_v10  ;;  %v2362_v25 = vld [vmem:[#allocation2 + $0x30] sm:$0xff]   ;;  %v2366_v29 = vld [vmem:[#allocation2 + $0x38] sm:$0xff]   ;;  %v65_v31 = vld [vmem:[%s2814_s0] sm:$0xff] }
  0x40   :  { %1998 = vmatpush3.bf16.msra.mxu0 %v2346_v9  ;;  %v2363_v26 = vld [vmem:[#allocation2 + $0xf0] sm:$0xff]   ;;  %v2367_v30 = vld [vmem:[#allocation2 + $0xf8] sm:$0xff]   ;;  %v1836_v32 = vcombine.low %v65_v31, %v65_v31  ;;  %v1837_v33 = vcombine.high %v65_v31, %v65_v31  ;;  %v66_v36 = vld [vmem:[%s2814_s0 + $0x8] sm:$0xff] }
  0x41   :  { %1999 = vmatprep.subr.bf16.mxu0 %v2349_v12  ;;  %v2364_v27 = vld [vmem:[#allocation2 + $0xb0] sm:$0xff]   ;;  %v2370_v34 = vld [vmem:[#allocation2 + $0xb8] sm:$0xff]   ;;  %v1838_v37 = vcombine.low %v66_v36, %v66_v36  ;;  %v1839_v38 = vcombine.high %v66_v36, %v66_v36  ;;  %v2373_v39 = vld [vmem:[#allocation2 + $0x100] sm:$0xff]  }
  0x42   :  { %2020 = vmatpush3.bf16.msra.mxu1 %v2348_v11  ;;  %443 = vmatprep.mubr.bf16.mxu0 %v1837_v33  ;;  %v2374_v40 = vld [vmem:[#allocation2 + $0x108] sm:$0xff]   ;;  %v2375_v41 = vld [vmem:[#allocation2 + $0x110] sm:$0xff]   ;;  %v2376_v42 = vld [vmem:[#allocation2 + $0x118] sm:$0xff]  }
  0x43   :  { %2021 = vmatprep.subr.bf16.mxu1 %v2351_v14  ;;  %483 = vmatprep.mubr.bf16.mxu1 %v1839_v38  ;;  %v2377_v43 = vld [vmem:[#allocation2 + $0x120] sm:$0xff]   ;;  %v2378_v44 = vld [vmem:[#allocation2 + $0x128] sm:$0xff]   ;;  %v2379_v45 = vld [vmem:[#allocation2 + $0x130] sm:$0xff]  }
  0x44   :  { %2000 = vmatpush3.bf16.msra.mxu0 %v2350_v13  ;;  %v2380_v46 = vld [vmem:[#allocation2 + $0x138] sm:$0xff]   ;;  %v2381_v47 = vld [vmem:[%s2814_s0 + $0x10] ss:$0 sps:$4 sm:$0xff]   ;;  %v2382_v48 = vld [vmem:[#allocation4] sm:$0xff]  }
  0x45   :  { %2001 = vmatprep.subr.bf16.mxu0 %v2353_v16  ;;  %v2383_v49 = vld [vmem:[#allocation4 + $0x8] sm:$0xff]   ;;  %v2384_v50 = vld [vmem:[#allocation4 + $0x10] sm:$0xff]   ;;  %v2385_v51 = vld [vmem:[#allocation4 + $0x18] sm:$0xff]  }
  0x46   :  { %2022 = vmatpush3.bf16.msra.mxu1 %v2352_v15  ;;  %v2386_v52 = vld [vmem:[#allocation4 + $0x20] sm:$0xff]   ;;  %v2387_v53 = vld [vmem:[#allocation4 + $0x28] sm:$0xff]   ;;  %v2388_v54 = vld [vmem:[#allocation4 + $0x30] sm:$0xff]  }
  0x47   :  { %2023 = vmatprep.subr.bf16.mxu1 %v2355_v18  ;;  %v2389_v55 = vld [vmem:[#allocation4 + $0x38] sm:$0xff]   ;;  %v2390_v56 = vld [vmem:[#allocation4 + $0x40] sm:$0xff]   ;;  %v2391_v57 = vld [vmem:[#allocation4 + $0x48] sm:$0xff]  }
  0x48   :  { %2002 = vmatpush3.bf16.msra.mxu0 %v2354_v17  ;;  %v2392_v58 = vld [vmem:[#allocation4 + $0x50] sm:$0xff]   ;;  %v2393_v59 = vld [vmem:[#allocation4 + $0x58] sm:$0xff]   ;;  %v2394_v60 = vld [vmem:[#allocation4 + $0x60] sm:$0xff]  }
  0x49   :  { %2003 = vmatprep.subr.bf16.mxu0 %v2357_v20  ;;  %v2395_v61 = vld [vmem:[#allocation4 + $0x68] sm:$0xff]   ;;  %v2396_v62 = vld [vmem:[#allocation4 + $0x70] sm:$0xff]   ;;  %v1835_v0 = vld [vmem:[%s2818_s4] ss:$0 sm:$0xff] }
  0x4a   :  { %2024 = vmatpush3.bf16.msra.mxu1 %v2356_v19  ;;  %v2397_v18 = vld [vmem:[#allocation4 + $0x78] sm:$0xff]   ;;  %v2398_v19 = vld [vmem:[#allocation4 + $0x80] sm:$0xff]   ;;  %v2399_v20 = vld [vmem:[#allocation4 + $0x88] sm:$0xff]  }
  0x4b   :  { %2025 = vmatprep.subr.bf16.mxu1 %v2359_v22  ;;  %v2401_v22 = vld [vmem:[#allocation4 + $0x98] sm:$0xff]   ;;  %v2407_v36 = vld [vmem:[#allocation4 + $0xc8] sm:$0xff]  }
  0x4c   :  { %2004 = vmatpush3.bf16.msra.mxu0 %v2358_v21  ;;  %v2400_v21 = vld [vmem:[#allocation4 + $0x90] sm:$0xff]   ;;  %v2405_v33 = vld [vmem:[#allocation4 + $0xb8] sm:$0xff]  }
  0x4d   :  { %2005 = vmatprep.subr.bf16.mxu0 %v2361_v24  ;;  %v2403_v24 = vld [vmem:[#allocation4 + $0xa8] sm:$0xff]   ;;  %v2409_v38 = vld [vmem:[#allocation4 + $0xd8] sm:$0xff]  }
  0x4e   :  { %2026 = vmatpush3.bf16.msra.mxu1 %v2360_v23  ;;  %v2402_v23 = vld [vmem:[#allocation4 + $0xa0] sm:$0xff]  }
  0x4f   :  { %2027 = vmatprep.subr.bf16.mxu1 %v2363_v26  ;;  %v1881_v26 = vld [vmem:[%s2818_s4 + $0x1] ss:$0 sm:$0xff] }
  0x50   :  { %2006 = vmatpush3.bf16.msra.mxu0 %v2362_v25  ;;  %v2404_v25 = vld [vmem:[#allocation4 + $0xb0] sm:$0xff]  }
  0x51   :  { %2007 = vmatprep.subr.bf16.mxu0 %v2365_v28 }
  0x52   :  { %2028 = vmatpush3.bf16.msra.mxu1 %v2364_v27 }
  0x53   :  { %2029 = vmatprep.subr.bf16.mxu1 %v2367_v30 }
  0x54   :  { %2008 = vmatpush3.bf16.msra.mxu0 %v2366_v29 }
  0x55   :  { %2127 = vmatprep.subr.bf16.mxu0 %v2579_v35 }
  0x56   :  { %2030 = vmatpush3.bf16.msra.mxu1 %v2370_v34  ;;  %v2406_v34 = vld [vmem:[#allocation4 + $0xc0] sm:$0xff]  }
  0x57   :  { %444 = vmatmul.mubr.bf16.vlgmr.msra.gmra.mrb[0].mxu0 %v1836_v32  ;;  %2147 = vmatprep.subr.bf16.mxu1 %v2579_v35 }
  0x58   :  { %2128 = vmatpush3.bf16.msra.mxu0 %v2373_v39  ;;  %2143 = vmatprep.mubr.msk.bf16.mxu0 %vm2580_vm0, %v2579_v35  ;;  %v2410_v39 = vld [vmem:[#allocation4 + $0xe0] sm:$0xff]  }
  0x59   :  { %484 = vmatmul.mubr.bf16.vlgmr.msra.gmra.mrb[0].mxu1 %v1838_v37  ;;  %2129 = vmatprep.subr.bf16.mxu0 %v2579_v35  ;;  %v2408_v37 = vld [vmem:[#allocation4 + $0xd0] sm:$0xff]  }
  0x5a   :  { %2163 = vmatprep.mubr.msk.bf16.mxu1 %vm2580_vm0, %v2579_v35  ;;  %2148 = vmatpush3.bf16.msra.mxu1 %v2382_v48 }
  0x5b   :  { %2149 = vmatprep.subr.bf16.mxu1 %v2579_v35 }
  0x5c   :  { %2130 = vmatpush3.bf16.msra.mxu0 %v2374_v40  ;;  %v2411_v40 = vld [vmem:[#allocation4 + $0xe8] sm:$0xff]  }
  0x5d   :  { %2131 = vmatprep.subr.bf16.mxu0 %v2579_v35 }
  0x5e   :  { %2150 = vmatpush3.bf16.msra.mxu1 %v2383_v49  ;;  %v2413_v49 = vld [vmem:[#allocation4 + $0xf8] sm:$0xff]  }
  0x5f   :  { %2151 = vmatprep.subr.bf16.mxu1 %v2579_v35 }
  0x60   :  { %2132 = vmatpush3.bf16.msra.mxu0 %v2375_v41  ;;  %v2412_v41 = vld [vmem:[#allocation4 + $0xf0] sm:$0xff]  }
  0x61   :  { %2133 = vmatprep.subr.bf16.mxu0 %v2579_v35 }
  0x62   :  { %2152 = vmatpush3.bf16.msra.mxu1 %v2384_v50  ;;  %v2414_v50 = vld [vmem:[#allocation4 + $0x100] sm:$0xff]  }
  0x63   :  { %2153 = vmatprep.subr.bf16.mxu1 %v2579_v35 }
  0x64   :  { %2134 = vmatpush3.bf16.msra.mxu0 %v2376_v42  ;;  %v1890_v42 = vld [vmem:[%s2818_s4 + $0x2] ss:$0 sm:$0xff] }
  0x65   :  { %2135 = vmatprep.subr.bf16.mxu0 %v2579_v35 }
  0x66   :  { %2154 = vmatpush3.bf16.msra.mxu1 %v2385_v51  ;;  %v2415_v51 = vld [vmem:[#allocation4 + $0x108] sm:$0xff]  }
  0x67   :  { %2155 = vmatprep.subr.bf16.mxu1 %v2579_v35 }
  0x68   :  { %2136 = vmatpush3.bf16.msra.mxu0 %v2377_v43 }
  0x69   :  { %2137 = vmatprep.subr.bf16.mxu0 %v2579_v35 }
  0x6a   :  { %2156 = vmatpush3.bf16.msra.mxu1 %v2386_v52  ;;  %v2416_v52 = vld [vmem:[#allocation4 + $0x110] sm:$0xff]  }
  0x6b   :  { %2157 = vmatprep.subr.bf16.mxu1 %v2579_v35 }
  0x6c   :  { %2138 = vmatpush3.bf16.msra.mxu0 %v2378_v44 }
  0x6d   :  { %2139 = vmatprep.subr.bf16.mxu0 %v2579_v35 }
  0x6e   :  { %2158 = vmatpush3.bf16.msra.mxu1 %v2387_v53  ;;  %v2417_v53 = vld [vmem:[#allocation4 + $0x118] sm:$0xff]  }
  0x6f   :  { %2159 = vmatprep.subr.bf16.mxu1 %v2579_v35 }
  0x70   :  { %2140 = vmatpush3.bf16.msra.mxu0 %v2379_v45 }
  0x71   :  { %2141 = vmatprep.subr.bf16.mxu0 %v2579_v35 }
  0x72   :  { %2160 = vmatpush3.bf16.msra.mxu1 %v2388_v54  ;;  %v2418_v54 = vld [vmem:[#allocation4 + $0x120] sm:$0xff]  }
  0x73   :  { %2161 = vmatprep.subr.bf16.mxu1 %v2579_v35 }
  0x74   :  { %2142 = vmatpush3.bf16.msra.mxu0 %v2380_v46 }
  0x75   :  { %2167 = vmatprep.subr.bf16.mxu0 %v2579_v35 }
  0x76   :  { %2162 = vmatpush3.bf16.msra.mxu1 %v2389_v55  ;;  %v2419_v55 = vld [vmem:[#allocation4 + $0x128] sm:$0xff]  }
  0x77   :  { %2144 = vmatmul.mubr.bf16.vlgmr.msra.gmra.mrb[4].mxu0 %v2381_v47  ;;  %2187 = vmatprep.subr.bf16.mxu1 %v2579_v35 }
  0x78   :  { %2183 = vmatprep.mubr.msk.bf16.mxu0 %vm2580_vm0, %v2579_v35  ;;  %2168 = vmatpush3.bf16.msra.mxu0 %v2390_v56  ;;  %v2420_v56 = vld [vmem:[#allocation4 + $0x130] sm:$0xff]  }
  0x79   :  { %2169 = vmatprep.subr.bf16.mxu0 %v2579_v35 }
  0x7c   :  { %2170 = vmatpush3.bf16.msra.mxu0 %v2391_v57  ;;  %v1899_v57 = vld [vmem:[%s2818_s4 + $0x3] ss:$0 sm:$0xff] }
  0x7d   :  { %2171 = vmatprep.subr.bf16.mxu0 %v2579_v35 }
  0x80   :  { %2172 = vmatpush3.bf16.msra.mxu0 %v2392_v58 }
  0x81   :  { %2173 = vmatprep.subr.bf16.mxu0 %v2579_v35 }
  0x84   :  { %2174 = vmatpush3.bf16.msra.mxu0 %v2393_v59 }
  0x85   :  { %2175 = vmatprep.subr.bf16.mxu0 %v2579_v35 }
  0x88   :  { %2176 = vmatpush3.bf16.msra.mxu0 %v2394_v60 }
  0x89   :  { %2177 = vmatprep.subr.bf16.mxu0 %v2579_v35 }
  0x8c   :  { %2178 = vmatpush3.bf16.msra.mxu0 %v2395_v61 }
  0x8d   :  { %2179 = vmatprep.subr.bf16.mxu0 %v2579_v35 }
  0x90   :  { %2180 = vmatpush3.bf16.msra.mxu0 %v2396_v62 }
  0x91   :  { %2181 = vmatprep.subr.bf16.mxu0 %v2579_v35 }
  0x94   :  { %2182 = vmatpush3.bf16.msra.mxu0 %v2397_v18  ;;  %v2432_v18 = vld [vmem:[#allocation4 + $0x190] sm:$0xff]  }
  0x95   :  { %2207 = vmatprep.subr.bf16.mxu0 %v2579_v35 }
 0x12a   :  { %v2009_v63 = vpop.f32.mrb[0].mxu0 }
 0x12b   :  { %v2010_v1 = vpop.f32.mrb[1].mxu0 }
 0x12c   :  { %v2011_v2 = vadd.f32 %v2010_v1, %v2009_v63  ;;  %v2012_v3 = vpop.f32.mrb[2].mxu0  ;;  %v2031_v4 = vpop.f32.mrb[0].mxu1  ;;  %v2422_v1 = vld [vmem:[#allocation4 + $0x140] sm:$0xff]  }
 0x12d   :  { %v2013_v5 = vpop.f32.mrb[3].mxu0  ;;  %v2032_v6 = vpop.f32.mrb[1].mxu1  ;;  %v2424_v3 = vld [vmem:[#allocation4 + $0x150] sm:$0xff]  }
 0x12e   :  { %v446_v7 = vadd.f32 %v2011_v2, %v1835_v0  ;;  %v2033_v8 = vadd.f32 %v2032_v6, %v2031_v4  ;;  %v2034_v9 = vpop.f32.mrb[2].mxu1  ;;  %v2421_v0 = vld [vmem:[#allocation4 + $0x138] sm:$0xff]   ;;  %v2423_v2 = vld [vmem:[#allocation4 + $0x148] sm:$0xff]   ;;  %v2426_v5 = vld [vmem:[#allocation4 + $0x160] sm:$0xff]  }
 0x12f   :  { %v2035_v10 = vpop.f32.mrb[3].mxu1  ;;  %v2425_v4 = vld [vmem:[#allocation4 + $0x158] sm:$0xff]   ;;  %v2427_v6 = vld [vmem:[#allocation4 + $0x168] sm:$0xff]  }
 0x130   :  { %v486_v11 = vadd.f32 %v2033_v8, %v446_v7  ;;  %v2428_v7 = vld [vmem:[#allocation4 + $0x170] sm:$0xff]   ;;  %v1908_v8 = vld [vmem:[%s2818_s4 + $0x4] ss:$0 sm:$0xff] }
 0x14a   :  { %v525_v12 = vpop.f32.mrb[4].mxu0 }
 0x14b   :  { %v526_v13 = vadd.f32 %v525_v12, %v486_v11  ;;  %v2145_v14 = vpop.f32.mrb[5].mxu0 }
 0x14c   :  { %v528_v15 = vpop.f32.mrb[6].mxu0 }
 0x14d   :  { %v531_v16 = vpack.c.bf16 %v526_v13, %v526_v13  ;;  %v2146_v17 = vpop.f32.mrb[7].mxu0  ;;  %v2429_v15 = vld [vmem:[#allocation4 + $0x178] sm:$0xff]  }
 0x14e   :  { %v2431_v17 = vld [vmem:[#allocation4 + $0x188] sm:$0xff]  }
 0x14f   :  { %2164 = vmatmul.mubr.bf16.vlgmr.msra.gmra.mrb[4].mxu1 %v531_v16  ;;  %v2430_v16 = vld [vmem:[#allocation4 + $0x180] sm:$0xff]  }
 0x150   :  { %2203 = vmatprep.mubr.msk.bf16.mxu1 %vm2580_vm0, %v2579_v35  ;;  %2188 = vmatpush3.bf16.msra.mxu1 %v2398_v19  ;;  %v2433_v19 = vld [vmem:[#allocation4 + $0x198] sm:$0xff]  }
 0x151   :  { %2189 = vmatprep.subr.bf16.mxu1 %v2579_v35 }
 0x154   :  { %2190 = vmatpush3.bf16.msra.mxu1 %v2399_v20  ;;  %v2434_v20 = vld [vmem:[#allocation4 + $0x1a0] sm:$0xff]  }
 0x155   :  { %2191 = vmatprep.subr.bf16.mxu1 %v2579_v35 }
 0x158   :  { %2192 = vmatpush3.bf16.msra.mxu1 %v2400_v21  ;;  %v2435_v21 = vld [vmem:[#allocation4 + $0x1a8] sm:$0xff]  }
 0x159   :  { %2193 = vmatprep.subr.bf16.mxu1 %v2579_v35 }
 0x15c   :  { %2194 = vmatpush3.bf16.msra.mxu1 %v2401_v22  ;;  %v2436_v22 = vld [vmem:[#allocation4 + $0x1b0] sm:$0xff]  }
 0x15d   :  { %2195 = vmatprep.subr.bf16.mxu1 %v2579_v35 }
 0x160   :  { %2196 = vmatpush3.bf16.msra.mxu1 %v2402_v23  ;;  %v1917_v23 = vld [vmem:[%s2818_s4 + $0x5] ss:$0 sm:$0xff] }
 0x161   :  { %2197 = vmatprep.subr.bf16.mxu1 %v2579_v35 }
 0x164   :  { %2198 = vmatpush3.bf16.msra.mxu1 %v2403_v24 }
 0x165   :  { %2199 = vmatprep.subr.bf16.mxu1 %v2579_v35 }
 0x168   :  { %2200 = vmatpush3.bf16.msra.mxu1 %v2404_v25 }
 0x169   :  { %2201 = vmatprep.subr.bf16.mxu1 %v2579_v35 }
 0x16c   :  { %2202 = vmatpush3.bf16.msra.mxu1 %v2405_v33  ;;  %v2440_v33 = vld [vmem:[#allocation4 + $0x1d0] sm:$0xff]  }
 0x16d   :  { %2227 = vmatprep.subr.bf16.mxu1 %v2579_v35 }
 0x222   :  { %v635_v27 = vpop.f32.mrb[4].mxu1 }
 0x223   :  { %v636_v28 = vadd.f32 %v1881_v26, %v635_v27  ;;  %v2165_v29 = vpop.f32.mrb[5].mxu1 }
 0x224   :  { %v638_v30 = vpop.f32.mrb[6].mxu1 }
 0x225   :  { %v641_v31 = vpack.c.bf16 %v636_v28, %v636_v28  ;;  %v2166_v32 = vpop.f32.mrb[7].mxu1  ;;  %v2437_v30 = vld [vmem:[#allocation4 + $0x1b8] sm:$0xff]  }
 0x226   :  { %v2439_v32 = vld [vmem:[#allocation4 + $0x1c8] sm:$0xff]  }
 0x227   :  { %2184 = vmatmul.mubr.bf16.vlgmr.msra.gmra.mrb[8].mxu0 %v641_v31  ;;  %v2438_v31 = vld [vmem:[#allocation4 + $0x1c0] sm:$0xff]  }
 0x228   :  { %2223 = vmatprep.mubr.msk.bf16.mxu0 %vm2580_vm0, %v2579_v35  ;;  %2208 = vmatpush3.bf16.msra.mxu0 %v2406_v34  ;;  %v2441_v34 = vld [vmem:[#allocation4 + $0x1d8] sm:$0xff]  }
 0x229   :  { %2209 = vmatprep.subr.bf16.mxu0 %v2579_v35 }
 0x22c   :  { %2210 = vmatpush3.bf16.msra.mxu0 %v2407_v36  ;;  %v2442_v36 = vld [vmem:[#allocation4 + $0x1e0] sm:$0xff]  }
 0x22d   :  { %2211 = vmatprep.subr.bf16.mxu0 %v2579_v35 }
 0x230   :  { %2212 = vmatpush3.bf16.msra.mxu0 %v2408_v37  ;;  %v2443_v37 = vld [vmem:[#allocation4 + $0x1e8] sm:$0xff]  }
 0x231   :  { %2213 = vmatprep.subr.bf16.mxu0 %v2579_v35 }
 0x234   :  { %2214 = vmatpush3.bf16.msra.mxu0 %v2409_v38  ;;  %v2444_v38 = vld [vmem:[#allocation4 + $0x1f0] sm:$0xff]  }
 0x235   :  { %2215 = vmatprep.subr.bf16.mxu0 %v2579_v35 }
 0x238   :  { %2216 = vmatpush3.bf16.msra.mxu0 %v2410_v39  ;;  %v1926_v39 = vld [vmem:[%s2818_s4 + $0x6] ss:$0 sm:$0xff] }
 0x239   :  { %2217 = vmatprep.subr.bf16.mxu0 %v2579_v35 }
 0x23c   :  { %2218 = vmatpush3.bf16.msra.mxu0 %v2411_v40 }
 0x23d   :  { %2219 = vmatprep.subr.bf16.mxu0 %v2579_v35 }
 0x240   :  { %2220 = vmatpush3.bf16.msra.mxu0 %v2412_v41 }
 0x241   :  { %2221 = vmatprep.subr.bf16.mxu0 %v2579_v35 }
 0x244   :  { %2222 = vmatpush3.bf16.msra.mxu0 %v2413_v49  ;;  %v2451_v49 = vld [vmem:[#allocation6 + $0xc] ss:$20 sps:$4 sm:$0xff]  }
 0x245   :  { %2247 = vmatprep.subr.bf16.mxu0 %v2579_v35 }
 0x2fa   :  { %v746_v43 = vpop.f32.mrb[8].mxu0 }
 0x2fb   :  { %v747_v44 = vadd.f32 %v1890_v42, %v746_v43  ;;  %v2185_v45 = vpop.f32.mrb[9].mxu0 }
 0x2fc   :  { %v749_v46 = vpop.f32.mrb[10].mxu0 }
 0x2fd   :  { %v752_v47 = vpack.c.bf16 %v747_v44, %v747_v44  ;;  %v2186_v48 = vpop.f32.mrb[11].mxu0  ;;  %v2445_v46 = vld [vmem:[#allocation4 + $0x1f8] sm:$0xff]  }
 0x2fe   :  { %v2448_v48 = vld [vmem:[#allocation6 + $0x4] ss:$20 sps:$4 sm:$0xff]  }
 0x2ff   :  { %2204 = vmatmul.mubr.bf16.vlgmr.msra.gmra.mrb[8].mxu1 %v752_v47  ;;  %v2446_v47 = vld [vmem:[#allocation6] ss:$20 sps:$4 sm:$0xff]  }
 0x300   :  { %2243 = vmatprep.mubr.msk.bf16.mxu1 %vm2580_vm0, %v2579_v35  ;;  %2228 = vmatpush3.bf16.msra.mxu1 %v2414_v50  ;;  %v2454_v50 = vld [vmem:[#allocation6 + $0x2c] ss:$20 sps:$4 sm:$0xff]  }
 0x301   :  { %2229 = vmatprep.subr.bf16.mxu1 %v2579_v35 }
 0x304   :  { %2230 = vmatpush3.bf16.msra.mxu1 %v2415_v51  ;;  %v2452_v51 = vld [vmem:[#allocation6 + $0x28] ss:$20 sps:$4 sm:$0xff]  }
 0x305   :  { %2231 = vmatprep.subr.bf16.mxu1 %v2579_v35 }
 0x308   :  { %2232 = vmatpush3.bf16.msra.mxu1 %v2416_v52  ;;  %v2460_v52 = vld [vmem:[#allocation6 + $0x54] ss:$20 sps:$4 sm:$0xff]  }
 0x309   :  { %2233 = vmatprep.subr.bf16.mxu1 %v2579_v35 }
 0x30c   :  { %2234 = vmatpush3.bf16.msra.mxu1 %v2417_v53  ;;  %v2458_v53 = vld [vmem:[#allocation6 + $0x50] ss:$20 sps:$4 sm:$0xff]  }
 0x30d   :  { %2235 = vmatprep.subr.bf16.mxu1 %v2579_v35 }
 0x310   :  { %2236 = vmatpush3.bf16.msra.mxu1 %v2418_v54  ;;  %v2466_v54 = vld [vmem:[#allocation6 + $0x7c] ss:$20 sps:$4 sm:$0xff]  }
 0x311   :  { %2237 = vmatprep.subr.bf16.mxu1 %v2579_v35 }
 0x314   :  { %2238 = vmatpush3.bf16.msra.mxu1 %v2419_v55  ;;  %v2464_v55 = vld [vmem:[#allocation6 + $0x78] ss:$20 sps:$4 sm:$0xff]  }
 0x315   :  { %2239 = vmatprep.subr.bf16.mxu1 %v2579_v35 }
 0x318   :  { %2240 = vmatpush3.bf16.msra.mxu1 %v2420_v56  ;;  %v2472_v56 = vld [vmem:[#allocation6 + $0xa4] ss:$20 sps:$4 sm:$0xff]  }
 0x319   :  { %2241 = vmatprep.subr.bf16.mxu1 %v2579_v35 }
 0x31c   :  { %2242 = vmatpush3.bf16.msra.mxu1 %v2421_v0 }
 0x31d   :  { %2267 = vmatprep.subr.bf16.mxu1 %v2579_v35 }
 0x3d2   :  { %v857_v58 = vpop.f32.mrb[8].mxu1 }
 0x3d3   :  { %v858_v59 = vadd.f32 %v1899_v57, %v857_v58  ;;  %v2205_v60 = vpop.f32.mrb[9].mxu1  ;;  %v2470_v57 = vld [vmem:[#allocation6 + $0xa0] ss:$20 sps:$4 sm:$0xff]  }
 0x3d4   :  { %v860_v61 = vpop.f32.mrb[10].mxu1  ;;  %v2478_v58 = vld [vmem:[#allocation6 + $0xcc] ss:$20 sps:$4 sm:$0xff]   ;;  %v2484_v60 = vld [vmem:[#allocation6 + $0xf4] ss:$20 sps:$4 sm:$0xff]  }
 0x3d5   :  { %v863_v62 = vpack.c.bf16 %v858_v59, %v858_v59  ;;  %v2206_v63 = vpop.f32.mrb[11].mxu1  ;;  %v2476_v59 = vld [vmem:[#allocation6 + $0xc8] ss:$20 sps:$4 sm:$0xff]   ;;  %v2482_v61 = vld [vmem:[#allocation6 + $0xf0] ss:$20 sps:$4 sm:$0xff]  }
 0x3d7   :  { %2224 = vmatmul.mubr.bf16.vlgmr.msra.gmra.mrb[12].mxu0 %v863_v62  ;;  %v1935_v62 = vld [vmem:[%s2818_s4 + $0x7] ss:$0 sm:$0xff] }
 0x3d8   :  { %2263 = vmatprep.mubr.msk.bf16.mxu0 %vm2580_vm0, %v2579_v35  ;;  %2248 = vmatpush3.bf16.msra.mxu0 %v2422_v1 }
 0x3d9   :  { %2249 = vmatprep.subr.bf16.mxu0 %v2579_v35 }
 0x3dc   :  { %2250 = vmatpush3.bf16.msra.mxu0 %v2423_v2 }
 0x3dd   :  { %2251 = vmatprep.subr.bf16.mxu0 %v2579_v35 }
 0x3e0   :  { %2252 = vmatpush3.bf16.msra.mxu0 %v2424_v3  ;;  %v2449_v3 = vld [vmem:[#allocation6 + $0x8] ss:$20 sps:$4 sm:$0xff]  }
 0x3e1   :  { %2253 = vmatprep.subr.bf16.mxu0 %v2579_v35 }
 0x3e4   :  { %2254 = vmatpush3.bf16.msra.mxu0 %v2425_v4 }
 0x3e5   :  { %2255 = vmatprep.subr.bf16.mxu0 %v2579_v35 }
 0x3e8   :  { %2256 = vmatpush3.bf16.msra.mxu0 %v2426_v5 }
 0x3e9   :  { %2257 = vmatprep.subr.bf16.mxu0 %v2579_v35 }
 0x3ec   :  { %2258 = vmatpush3.bf16.msra.mxu0 %v2427_v6  ;;  %v2457_v6 = vld [vmem:[#allocation6 + $0x34] ss:$20 sps:$4 sm:$0xff]  }
 0x3ed   :  { %2259 = vmatprep.subr.bf16.mxu0 %v2579_v35 }
 0x3f0   :  { %2260 = vmatpush3.bf16.msra.mxu0 %v2428_v7  ;;  %v2455_v7 = vld [vmem:[#allocation6 + $0x30] ss:$20 sps:$4 sm:$0xff]  }
 0x3f1   :  { %2261 = vmatprep.subr.bf16.mxu0 %v2579_v35 }
 0x3f4   :  { %2262 = vmatpush3.bf16.msra.mxu0 %v2429_v15  ;;  %v2479_v15 = vld [vmem:[#allocation6 + $0xd0] ss:$20 sps:$4 sm:$0xff]  }
 0x3f5   :  { %2287 = vmatprep.subr.bf16.mxu0 %v2579_v35 }
 0x4aa   :  { %v968_v9 = vpop.f32.mrb[12].mxu0 }
 0x4ab   :  { %v969_v10 = vadd.f32 %v1908_v8, %v968_v9  ;;  %v2225_v11 = vpop.f32.mrb[13].mxu0  ;;  %v2463_v8 = vld [vmem:[#allocation6 + $0x5c] ss:$20 sps:$4 sm:$0xff]   ;;  %v2461_v9 = vld [vmem:[#allocation6 + $0x58] ss:$20 sps:$4 sm:$0xff]  }
 0x4ac   :  { %v971_v12 = vpop.f32.mrb[14].mxu0  ;;  %v2467_v11 = vld [vmem:[#allocation6 + $0x80] ss:$20 sps:$4 sm:$0xff]  }
 0x4ad   :  { %v974_v13 = vpack.c.bf16 %v969_v10, %v969_v10  ;;  %v2226_v14 = vpop.f32.mrb[15].mxu0  ;;  %v2469_v10 = vld [vmem:[#allocation6 + $0x84] ss:$20 sps:$4 sm:$0xff]   ;;  %v2475_v12 = vld [vmem:[#allocation6 + $0xac] ss:$20 sps:$4 sm:$0xff]  }
 0x4ae   :  { %v2481_v14 = vld [vmem:[#allocation6 + $0xd4] ss:$20 sps:$4 sm:$0xff]  }
 0x4af   :  { %2244 = vmatmul.mubr.bf16.vlgmr.msra.gmra.mrb[12].mxu1 %v974_v13  ;;  %v2473_v13 = vld [vmem:[#allocation6 + $0xa8] ss:$20 sps:$4 sm:$0xff]  }
 0x4b0   :  { %2283 = vmatprep.mubr.msk.bf16.mxu1 %vm2580_vm0, %v2579_v35  ;;  %2268 = vmatpush3.bf16.msra.mxu1 %v2430_v16  ;;  %v2487_v16 = vld [vmem:[#allocation6 + $0xfc] ss:$20 sps:$4 sm:$0xff]  }
 0x4b1   :  { %2269 = vmatprep.subr.bf16.mxu1 %v2579_v35 }
 0x4b4   :  { %2270 = vmatpush3.bf16.msra.mxu1 %v2431_v17  ;;  %v2485_v17 = vld [vmem:[#allocation6 + $0xf8] ss:$20 sps:$4 sm:$0xff]  }
 0x4b5   :  { %2271 = vmatprep.subr.bf16.mxu1 %v2579_v35 }
 0x4b8   :  { %2272 = vmatpush3.bf16.msra.mxu1 %v2432_v18  ;;  %v2490_v18 = vld [vmem:[#allocation6 + $0x11c] ss:$20 sps:$4 sm:$0xff]  }
 0x4b9   :  { %2273 = vmatprep.subr.bf16.mxu1 %v2579_v35 }
 0x4bc   :  { %2274 = vmatpush3.bf16.msra.mxu1 %v2433_v19  ;;  %v2488_v19 = vld [vmem:[#allocation6 + $0x118] ss:$20 sps:$4 sm:$0xff]  }
 0x4bd   :  { %2275 = vmatprep.subr.bf16.mxu1 %v2579_v35 }
 0x4c0   :  { %2276 = vmatpush3.bf16.msra.mxu1 %v2434_v20  ;;  %v2493_v20 = vld [vmem:[#allocation6 + $0x124] ss:$20 sps:$4 sm:$0xff]  }
 0x4c1   :  { %2277 = vmatprep.subr.bf16.mxu1 %v2579_v35 }
 0x4c4   :  { %2278 = vmatpush3.bf16.msra.mxu1 %v2435_v21  ;;  %v2491_v21 = vld [vmem:[#allocation6 + $0x120] ss:$20 sps:$4 sm:$0xff]  }
 0x4c5   :  { %2279 = vmatprep.subr.bf16.mxu1 %v2579_v35 }
 0x4c8   :  { %2280 = vmatpush3.bf16.msra.mxu1 %v2436_v22  ;;  %v2581_v22 = vmov 0  }
 0x4c9   :  { %2281 = vmatprep.subr.bf16.mxu1 %v2579_v35 }
 0x4cc   :  { %2282 = vmatpush3.bf16.msra.mxu1 %v2437_v30 }
 0x4cd   :  { %1702 = vmatprep.subr.bf16.mxu1 %v2448_v48 }
 0x582   :  { %v1079_v24 = vpop.f32.mrb[12].mxu1 }
 0x583   :  { %v1080_v25 = vadd.f32 %v1917_v23, %v1079_v24  ;;  %v2245_v26 = vpop.f32.mrb[13].mxu1  ;;  %v1944_v23 = vld [vmem:[%s2818_s4 + $0x8] ss:$0 sm:$0xff] }
 0x584   :  { %v1082_v27 = vpop.f32.mrb[14].mxu1 }
 0x585   :  { %v1085_v28 = vpack.c.bf16 %v1080_v25, %v1080_v25  ;;  %v2246_v29 = vpop.f32.mrb[15].mxu1 }
 0x587   :  { %2264 = vmatmul.mubr.bf16.vlgmr.msra.gmra.mrb[16].mxu0 %v1085_v28  ;;  %v2494_v28 = vld [vmem:[#allocation6 + $0x10] ss:$20 sps:$4 sm:$0xff]  }
 0x588   :  { %2303 = vmatprep.mubr.msk.bf16.mxu0 %vm2580_vm0, %v2579_v35  ;;  %2288 = vmatpush3.bf16.msra.mxu0 %v2438_v31  ;;  %v2495_v31 = vld [vmem:[#allocation6 + $0x38] ss:$20 sps:$4 sm:$0xff]  }
 0x589   :  { %2289 = vmatprep.subr.bf16.mxu0 %v2579_v35 }
 0x58c   :  { %2290 = vmatpush3.bf16.msra.mxu0 %v2439_v32  ;;  %v2496_v32 = vld [vmem:[#allocation6 + $0x60] ss:$20 sps:$4 sm:$0xff]  }
 0x58d   :  { %2291 = vmatprep.subr.bf16.mxu0 %v2579_v35 }
 0x590   :  { %2292 = vmatpush3.bf16.msra.mxu0 %v2440_v33  ;;  %v2497_v33 = vld [vmem:[#allocation6 + $0x88] ss:$20 sps:$4 sm:$0xff]  }
 0x591   :  { %2293 = vmatprep.subr.bf16.mxu0 %v2579_v35 }
 0x594   :  { %2294 = vmatpush3.bf16.msra.mxu0 %v2441_v34  ;;  %v2498_v34 = vld [vmem:[#allocation6 + $0xb0] ss:$20 sps:$4 sm:$0xff]  }
 0x595   :  { %2295 = vmatprep.subr.bf16.mxu0 %v2579_v35 }
 0x598   :  { %2296 = vmatpush3.bf16.msra.mxu0 %v2442_v36  ;;  %v2499_v36 = vld [vmem:[#allocation6 + $0xd8] ss:$20 sps:$4 sm:$0xff]  }
 0x599   :  { %2297 = vmatprep.subr.bf16.mxu0 %v2579_v35 }
 0x59c   :  { %2298 = vmatpush3.bf16.msra.mxu0 %v2443_v37  ;;  %v2500_v37 = vld [vmem:[#allocation6 + $0x100] ss:$20 sps:$4 sm:$0xff]  }
 0x59d   :  { %2299 = vmatprep.subr.bf16.mxu0 %v2579_v35 }
 0x5a0   :  { %2300 = vmatpush3.bf16.msra.mxu0 %v2444_v38  ;;  %v2501_v38 = vld [vmem:[#allocation6 + $0x128] ss:$20 sps:$4 sm:$0xff]  }
 0x5a1   :  { %2301 = vmatprep.subr.bf16.mxu0 %v2579_v35 }
 0x5a4   :  { %2302 = vmatpush3.bf16.msra.mxu0 %v2445_v46 }
 0x5a5   :  { %1743 = vmatprep.subr.bf16.mxu0 %v2451_v49 }
 0x65a   :  { %v1190_v40 = vpop.f32.mrb[16].mxu0 }
 0x65b   :  { %v1191_v41 = vadd.f32 %v1926_v39, %v1190_v40  ;;  %v2265_v42 = vpop.f32.mrb[17].mxu0  ;;  %v1469_v39 = vlaneseq }
 0x65c   :  { %v1193_v43 = vpop.f32.mrb[18].mxu0 }
 0x65d   :  { %v1196_v44 = vpack.c.bf16 %v1191_v41, %v1191_v41  ;;  %v2266_v45 = vpop.f32.mrb[19].mxu0  ;;  %v1470_v40 = vshrl.u32 %v1469_v39, 7  ;;  %v1467_v43 = vld [vmem:[%s2819_s5] sm:$0x1f] }
 0x65f   :  { %2284 = vmatmul.mubr.bf16.vlgmr.msra.gmra.mrb[16].mxu1 %v1196_v44  ;;  %v1471_v41 = vsub.s32 0, %v1470_v40  ;;  %v1479_v42 = vsub.s32 2, %v1470_v40  ;;  %v1475_v44 = vsub.s32 1, %v1470_v40  ;;  %v1483_v45 = vsub.s32 3, %v1470_v40 }
 0x660   :  { %1703 = vmatpush1.bf16.msra.mxu1 %v2446_v47  ;;  %1734 = vmatprep.mubr.bf16.mxu1 %v2581_v22 }
 0x661   :  { %1704 = vmatprep.subr.bf16.mxu1 %v2454_v50  ;;  %v1472_v46 = vrot.slane %v1467_v43, %v1471_v41  ;;  %v1480_v47 = vrot.slane %v1467_v43, %v1479_v42  ;;  %v1476_v48 = vrot.slane %v1467_v43, %v1475_v44  ;;  %v1484_v49 = vrot.slane %v1467_v43, %v1483_v45 }
 0x664   :  { %1705 = vmatpush1.bf16.msra.mxu1 %v2452_v51 }
 0x665   :  { %1706 = vmatprep.subr.bf16.mxu1 %v2460_v52 }
 0x668   :  { %1707 = vmatpush1.bf16.msra.mxu1 %v2458_v53 }
 0x669   :  { %1708 = vmatprep.subr.bf16.mxu1 %v2466_v54 }
 0x66c   :  { %1709 = vmatpush1.bf16.msra.mxu1 %v2464_v55 }
 0x66d   :  { %1710 = vmatprep.subr.bf16.mxu1 %v2472_v56 }
 0x670   :  { %1711 = vmatpush1.bf16.msra.mxu1 %v2470_v57 }
 0x671   :  { %1712 = vmatprep.subr.bf16.mxu1 %v2478_v58 }
 0x674   :  { %1713 = vmatpush1.bf16.msra.mxu1 %v2476_v59 }
 0x675   :  { %1714 = vmatprep.subr.bf16.mxu1 %v2484_v60 }
 0x678   :  { %1715 = vmatpush1.bf16.msra.mxu1 %v2482_v61  ;;  %v1487_v61 = vsub.s32 4, %v1470_v40 }
 0x679   :  { %1716 = vmatprep.subr.bf16.mxu1 %v2490_v18 }
 0x67c   :  { %1717 = vmatpush1.bf16.msra.mxu1 %v2488_v19 }
 0x67d   :  { %2307 = vmatprep.subr.bf16.mxu1 %v2579_v35 }
 0x732   :  { %v1301_v63 = vpop.f32.mrb[16].mxu1 }
 0x733   :  { %v1302_v0 = vadd.f32 %v1935_v62, %v1301_v63  ;;  %v2285_v1 = vpop.f32.mrb[17].mxu1  ;;  %v1488_v62 = vrot.slane %v1467_v43, %v1487_v61 }
 0x734   :  { %v1304_v2 = vpop.f32.mrb[18].mxu1 }
 0x735   :  { %v1307_v4 = vpack.c.bf16 %v1302_v0, %v1302_v0  ;;  %v2286_v5 = vpop.f32.mrb[19].mxu1 }
 0x737   :  { %2304 = vmatmul.mubr.bf16.vlgmr.msra.gmra.mrb[20].mxu0 %v1307_v4 }
 0x738   :  { %1744 = vmatpush1.bf16.msra.mxu0 %v2449_v3  ;;  %1775 = vmatprep.mubr.bf16.mxu0 %v2581_v22 }
 0x739   :  { %1745 = vmatprep.subr.bf16.mxu0 %v2457_v6 }
 0x73c   :  { %1746 = vmatpush1.bf16.msra.mxu0 %v2455_v7 }
 0x73d   :  { %1747 = vmatprep.subr.bf16.mxu0 %v2463_v8 }
 0x740   :  { %1748 = vmatpush1.bf16.msra.mxu0 %v2461_v9 }
 0x741   :  { %1749 = vmatprep.subr.bf16.mxu0 %v2469_v10 }
 0x744   :  { %1750 = vmatpush1.bf16.msra.mxu0 %v2467_v11 }
 0x745   :  { %1751 = vmatprep.subr.bf16.mxu0 %v2475_v12 }
 0x748   :  { %1752 = vmatpush1.bf16.msra.mxu0 %v2473_v13 }
 0x749   :  { %1753 = vmatprep.subr.bf16.mxu0 %v2481_v14 }
 0x74c   :  { %1754 = vmatpush1.bf16.msra.mxu0 %v2479_v15 }
 0x74d   :  { %1755 = vmatprep.subr.bf16.mxu0 %v2487_v16 }
 0x750   :  { %1756 = vmatpush1.bf16.msra.mxu0 %v2485_v17 }
 0x751   :  { %1757 = vmatprep.subr.bf16.mxu0 %v2493_v20 }
 0x754   :  { %1758 = vmatpush1.bf16.msra.mxu0 %v2491_v21 }
 0x80a   :  { %v1412_v24 = vpop.f32.mrb[20].mxu0 }
 0x80b   :  { %v1413_v25 = vadd.f32 %v1944_v23, %v1412_v24  ;;  %v2305_v26 = vpop.f32.mrb[21].mxu0 }
 0x80c   :  { %v1415_v27 = vpop.f32.mrb[22].mxu0 }
 0x80d   :  { %v1418_v29 = vpack.c.bf16 %v1413_v25, %v1413_v25  ;;  %v2306_v30 = vpop.f32.mrb[23].mxu0 }
 0x80f   :  { %1735 = vmatmul.mubr.bf16.vlgmr.msra.gmra.mrb[20].mxu1 %v1418_v29  ;;  %1776 = vmatmul.mubr.bf16.vlgmr.msra.gmra.mrb[24].mxu0 %v1418_v29 }
 0x810   :  { %2308 = vmatpush3.bf16.msra.mxu1 %v2494_v28  ;;  %2323 = vmatprep.mubr.msk.bf16.mxu1 %vm2580_vm0, %v2579_v35 }
 0x811   :  { %2309 = vmatprep.subr.bf16.mxu1 %v2579_v35 }
 0x814   :  { %2310 = vmatpush3.bf16.msra.mxu1 %v2495_v31 }
 0x815   :  { %2311 = vmatprep.subr.bf16.mxu1 %v2579_v35 }
 0x818   :  { %2312 = vmatpush3.bf16.msra.mxu1 %v2496_v32 }
 0x819   :  { %2313 = vmatprep.subr.bf16.mxu1 %v2579_v35 }
 0x81c   :  { %2314 = vmatpush3.bf16.msra.mxu1 %v2497_v33 }
 0x81d   :  { %2315 = vmatprep.subr.bf16.mxu1 %v2579_v35 }
 0x820   :  { %2316 = vmatpush3.bf16.msra.mxu1 %v2498_v34 }
 0x821   :  { %2317 = vmatprep.subr.bf16.mxu1 %v2579_v35 }
 0x824   :  { %2318 = vmatpush3.bf16.msra.mxu1 %v2499_v36 }
 0x825   :  { %2319 = vmatprep.subr.bf16.mxu1 %v2579_v35 }
 0x828   :  { %2320 = vmatpush3.bf16.msra.mxu1 %v2500_v37 }
 0x829   :  { %2321 = vmatprep.subr.bf16.mxu1 %v2579_v35 }
 0x82c   :  { %2322 = vmatpush3.bf16.msra.mxu1 %v2501_v38 }
 0x82f   :  { %2324 = vmatmul.mubr.bf16.vlgmr.msra.gmra.mrb[24].mxu1 %v1418_v29 }
 0x8e2   :  { %v1736_v50 = vpop.f32.mrb[20].mxu1  ;;  %v1777_v51 = vpop.f32.mrb[24].mxu0 }
 0x8e3   :  { %v1737_v52 = vadd.f32 %v1736_v50, %v1472_v46  ;;  %v1778_v35 = vadd.f32 %v1777_v51, %v1480_v47  ;;  %v1738_v53 = vpop.f32.mrb[21].mxu1  ;;  %v1779_v54 = vpop.f32.mrb[25].mxu0 }
 0x8e4   :  { %v1739_v55 = vadd.f32 %v1738_v53, %v1476_v48  ;;  %v1780_v56 = vadd.f32 %v1779_v54, %v1484_v49  ;;  %v1740_v57 = vpop.f32.mrb[22].mxu1  ;;  %v1781_v58 = vpop.f32.mrb[26].mxu0 }
 0x8e5   :  { %1824 = vst [vmem:[%s2820_s6] sm:$0xff] %v1737_v52  ;;  %1826 = vst [vmem:[%s2820_s6 + $0x10] sm:$0xff] %v1778_v35  ;;  %v1741_v59 = vpop.f32.mrb[23].mxu1  ;;  %v1782_v60 = vpop.f32.mrb[27].mxu0 }
 0x8e6   :  { %1825 = vst [vmem:[%s2820_s6 + $0x8] sm:$0xff] %v1739_v55  ;;  %1827 = vst [vmem:[%s2820_s6 + $0x18] sm:$0xff] %v1780_v56 }
 0x902   :  { %v1818_v63 = vpop.f32.mrb[24].mxu1 }
 0x903   :  { %v1819_v0 = vadd.f32 %v1818_v63, %v1488_v62  ;;  %v2325_v1 = vpop.f32.mrb[25].mxu1 }
 0x904   :  { %v1821_v2 = vpop.f32.mrb[26].mxu1 }
 0x905   :  { %1828 = vst [vmem:[%s2820_s6 + $0x20] sm:$0xff] %v1819_v0  ;;  %v2326_v3 = vpop.f32.mrb[27].mxu1 }
 0x906   :  { %1833 = vsyncpa [#allocation3], 1 }
 0x907   :  { %1834 = vsyncpa [#allocation5], 1 }

</bundles_post_ra>
